<compile_context>
chip_gen: v7x
topology: tpu7x:2x2x1
jax: 0.10.0
libtpu: 0.0.40
codegen_flags: <defaults>
</compile_context>

<pallas_src>
import jax
import jax.numpy as jnp
from jax.experimental import pallas as pl
from jax.experimental.pallas import tpu as pltpu


# ----------------------------------------------------------------------------
# Pallas kernel: one spatial tile (batch folded into the lane axis) per step.
# ----------------------------------------------------------------------------
def qmap_down_kernel(p_ref, w0_ref, b0_ref, w1_ref, b1_ref, o_ref):
    # p_ref : (9*c_in, TS)   im2col patches, spatial (incl. batch) on lanes
    # w0_ref: (c_out, 9*c_in) conv3x3 weight, (o, ky, kx, i) flattened
    # b0_ref: (c_out, 1)
    # w1_ref: (c_out, c_out)  conv1x1 weight
    # b1_ref: (c_out, 1)
    # o_ref : (c_out, TS)     output, flattened (c_out, N*Ho*Wo) layout
    p = p_ref[...]                                              # (9*c_in, TS)

    h = jnp.dot(w0_ref[...], p,
                preferred_element_type=jnp.float32) + b0_ref[...]
    h = jnp.maximum(h, 0.1 * h)                                 # LeakyReLU(0.1)

    y = jnp.dot(w1_ref[...], h,
                preferred_element_type=jnp.float32) + b1_ref[...]
    o_ref[...] = y.astype(o_ref.dtype)


# ----------------------------------------------------------------------------
# Wrapper (plain-JAX glue: padding + stride-2 im2col + weight repack)
# ----------------------------------------------------------------------------
def _round_up(x, m):
    return ((x + m - 1) // m) * m


def _pick_spatial_tile(s_total, bytes_per_lane, vmem_budget=8 << 20):
    """Largest multiple-of-128 lane tile whose double-buffered blocks fit the
    VMEM budget (capped at 8192), but never larger than the (128-rounded)
    problem size."""
    cap = (vmem_budget // max(bytes_per_lane, 1)) // 128 * 128
    cap = max(128, min(cap, 8192))
    return min(cap, _round_up(s_total, 128))


def qmap_downsample_pallas(x_nchw, params):
    """x: (N, c_in, H, W) f32; params = (w0 OIHW, b0, w1 OIHW(1x1), b1)."""
    w0, b0, w1, b1 = params
    N, C, H, W = x_nchw.shape
    c_out = w0.shape[0]
    Ho, Wo = (H + 1) // 2, (W + 1) // 2
    S = N * Ho * Wo                                    # batch folded into lanes

    x = x_nchw.astype(jnp.float32)

    # --- stride-2, pad-1, 3x3 im2col (glue), channels-on-sublane layout -----
    xp = jnp.pad(x, ((0, 0), (0, 0), (1, 1), (1, 1)))          # (N,C,H+2,W+2)
    xp = jnp.transpose(xp, (1, 0, 2, 3))                        # (C,N,H+2,W+2)
    taps = []
    for ky in range(3):
        for kx in range(3):
            taps.append(xp[:, :, ky:ky + 2 * Ho - 1:2, kx:kx + 2 * Wo - 1:2])
    # (9, C, N, Ho, Wo) ordered (ky*3+kx, c) to match the repacked weight,
    # flattened to (9*C, N*Ho*Wo).
    patches = jnp.stack(taps, axis=0).reshape(9 * C, S)

    # --- weight repack -------------------------------------------------------
    # OIHW -> (c_out, 3, 3, c_in) -> (c_out, 9*c_in), index = (ky*3+kx)*C + c.
    w0r = jnp.transpose(w0, (0, 2, 3, 1)).reshape(c_out, 9 * C).astype(jnp.float32)
    b0r = b0.reshape(c_out, 1).astype(jnp.float32)
    w1r = w1.reshape(c_out, c_out).astype(jnp.float32)
    b1r = b1.reshape(c_out, 1).astype(jnp.float32)

    # --- lane tiling: always a multiple of 128 (pad the lane axis) -----------
    bytes_per_lane = (9 * C + c_out) * 4 * 2          # dbl-buffered in + out
    TS = _pick_spatial_tile(S, bytes_per_lane)
    S_pad = _round_up(S, TS)
    if S_pad != S:
        patches = jnp.pad(patches, ((0, 0), (0, S_pad - S)))
    n_s = S_pad // TS

    out_flat = pl.pallas_call(
        qmap_down_kernel,
        out_shape=jax.ShapeDtypeStruct((c_out, S_pad), jnp.float32),
        grid_spec=pltpu.PrefetchScalarGridSpec(
            num_scalar_prefetch=0,
            grid=(n_s,),
            in_specs=[
                pl.BlockSpec((9 * C, TS), lambda s: (0, s)),     # patches
                pl.BlockSpec((c_out, 9 * C), lambda s: (0, 0)),  # w0
                pl.BlockSpec((c_out, 1), lambda s: (0, 0)),      # b0
                pl.BlockSpec((c_out, c_out), lambda s: (0, 0)),  # w1
                pl.BlockSpec((c_out, 1), lambda s: (0, 0)),      # b1
            ],
            out_specs=pl.BlockSpec((c_out, TS), lambda s: (0, s)),
        ),
        compiler_params=pltpu.CompilerParams(
            dimension_semantics=("parallel",)),
    )(patches, w0r, b0r, w1r, b1r)

    # Un-pad, un-flatten, and put batch back in front (layout plumbing only).
    out = out_flat[:, :S].reshape(c_out, N, Ho, Wo)
    return jnp.transpose(out, (1, 0, 2, 3))


# ----------------------------------------------------------------------------
# Pure-JAX reference (for correctness check)
# ----------------------------------------------------------------------------
def qmap_downsample_ref(x, params):
    w0, b0, w1, b1 = params
    y = jax.lax.conv_general_dilated(
        x, jnp.transpose(w0, (2, 3, 1, 0)), (2, 2), ((1, 1), (1, 1)),
        dimension_numbers=('NCHW', 'HWIO', 'NCHW'))
    y = y + b0.reshape(1, -1, 1, 1)
    y = jnp.where(y > 0, y, 0.1 * y)                    # LeakyReLU(0.1)
    y = jax.lax.conv_general_dilated(
        y, jnp.transpose(w1, (2, 3, 1, 0)), (1, 1), ((0, 0), (0, 0)),
        dimension_numbers=('NCHW', 'HWIO', 'NCHW'))
    return y + b1.reshape(1, -1, 1, 1)


if __name__ == "__main__":
    # Small shapes consistent with the module: QmapDownsample(c_in=4, c_out=32)
    N, c_in, c_out, H, W = 2, 4, 32, 16, 16

    key = jax.random.PRNGKey(0)
    ks = jax.random.split(key, 5)
    x = jax.random.normal(ks[0], (N, c_in, H, W), jnp.float32)
    w0 = jax.random.normal(ks[1], (c_out, c_in, 3, 3), jnp.float32) * 0.1
    b0 = jax.random.normal(ks[2], (c_out,), jnp.float32) * 0.1
    w1 = jax.random.normal(ks[3], (c_out, c_out, 1, 1), jnp.float32) * 0.1
    b1 = jax.random.normal(ks[4], (c_out,), jnp.float32) * 0.1
    params = (w0, b0, w1, b1)

    out = qmap_downsample_pallas(x, params)
    jax.block_until_ready(out)

    ref = qmap_downsample_ref(x, params)
    assert out.shape == (N, c_out, (H + 1) // 2, (W + 1) // 2), out.shape
    max_err = float(jnp.max(jnp.abs(out - ref)))
    assert max_err < 1e-3, f"mismatch vs reference: {max_err}"
    print("KERNEL_OK")
</pallas_src>

<mosaic_0001>
module attributes {stable_mosaic.version = 11 : i64} {
  func.func @qmap_down_kernel(%arg0: i32, %arg1: memref<36x128xf32, #tpu.memory_space<vmem>>, %arg2: memref<32x36xf32, #tpu.memory_space<vmem>>, %arg3: memref<32x1xf32, #tpu.memory_space<vmem>>, %arg4: memref<32x32xf32, #tpu.memory_space<vmem>>, %arg5: memref<32x1xf32, #tpu.memory_space<vmem>>, %arg6: memref<32x128xf32, #tpu.memory_space<vmem>>) attributes {dimension_semantics = [#tpu.dimension_semantics<parallel>], iteration_bounds = array<i64: 1>, scalar_prefetch = 0 : i64, scratch_operands = 0 : i64, tpu.core_type = #tpu.core_type<tc>, window_params = [{transform_indices = @transform_0, window_bounds = array<i64: 36, 128>}, {pipeline_mode = #tpu.pipeline_mode<synchronous>, transform_indices = @transform_1, window_bounds = array<i64: 32, 36>}, {pipeline_mode = #tpu.pipeline_mode<synchronous>, transform_indices = @transform_2, window_bounds = array<i64: 32, 1>}, {pipeline_mode = #tpu.pipeline_mode<synchronous>, transform_indices = @transform_3, window_bounds = array<i64: 32, 32>}, {pipeline_mode = #tpu.pipeline_mode<synchronous>, transform_indices = @transform_4, window_bounds = array<i64: 32, 1>}, {transform_indices = @transform_5, window_bounds = array<i64: 32, 128>}]} {
    %c0 = arith.constant 0 : index
    %c0_0 = arith.constant 0 : index
    %0 = vector.load %arg1[%c0, %c0_0] : memref<36x128xf32, #tpu.memory_space<vmem>>, vector<36x128xf32>
    %c0_1 = arith.constant 0 : index
    %c0_2 = arith.constant 0 : index
    %1 = vector.load %arg2[%c0_1, %c0_2] : memref<32x36xf32, #tpu.memory_space<vmem>>, vector<32x36xf32>
    %cst = arith.constant dense<0.000000e+00> : vector<32x128xf32>
    %2 = tpu.matmul %1, %0, %cst {dimension_numbers = #tpu.dot_dimension_numbers<[1], [0], [0], [1], [0, 0, 1, 1], [], []>} : vector<32x36xf32>, vector<36x128xf32>, vector<32x128xf32> -> vector<32x128xf32>
    %c0_3 = arith.constant 0 : index
    %c0_4 = arith.constant 0 : index
    %3 = vector.load %arg3[%c0_3, %c0_4] : memref<32x1xf32, #tpu.memory_space<vmem>>, vector<32x1xf32>
    %4 = vector.broadcast %3 : vector<32x1xf32> to vector<32x128xf32>
    %5 = arith.addf %2, %4 : vector<32x128xf32>
    %cst_5 = arith.constant 1.000000e-01 : f32
    %6 = vector.broadcast %cst_5 : f32 to vector<32x128xf32>
    %7 = arith.mulf %6, %5 : vector<32x128xf32>
    %8 = arith.maximumf %5, %7 : vector<32x128xf32>
    %c0_6 = arith.constant 0 : index
    %c0_7 = arith.constant 0 : index
    %9 = vector.load %arg4[%c0_6, %c0_7] : memref<32x32xf32, #tpu.memory_space<vmem>>, vector<32x32xf32>
    %cst_8 = arith.constant dense<0.000000e+00> : vector<32x128xf32>
    %10 = tpu.matmul %9, %8, %cst_8 {dimension_numbers = #tpu.dot_dimension_numbers<[1], [0], [0], [1], [0, 0, 1, 1], [], []>} : vector<32x32xf32>, vector<32x128xf32>, vector<32x128xf32> -> vector<32x128xf32>
    %c0_9 = arith.constant 0 : index
    %c0_10 = arith.constant 0 : index
    %11 = vector.load %arg5[%c0_9, %c0_10] : memref<32x1xf32, #tpu.memory_space<vmem>>, vector<32x1xf32>
    %12 = vector.broadcast %11 : vector<32x1xf32> to vector<32x128xf32>
    %13 = arith.addf %10, %12 : vector<32x128xf32>
    %c0_11 = arith.constant 0 : index
    %c0_12 = arith.constant 0 : index
    %14 = vector.load %arg6[%c0_11, %c0_12] : memref<32x128xf32, #tpu.memory_space<vmem>>, vector<32x128xf32>
    tpu.vector_store %arg6[%c0_11, %c0_12], %13 {strides = array<i32>} : memref<32x128xf32, #tpu.memory_space<vmem>>, vector<32x128xf32>,
    return
  }
  func.func @transform_0(%arg0: i32) -> (i32, i32) {
    %c0_i32 = arith.constant 0 : i32
    %c0_i32_0 = arith.constant 0 : i32
    return %c0_i32, %arg0 : i32, i32
  }
  func.func @transform_1(%arg0: i32) -> (i32, i32) {
    %c0_i32 = arith.constant 0 : i32
    %c0_i32_0 = arith.constant 0 : i32
    %c0_i32_1 = arith.constant 0 : i32
    return %c0_i32, %c0_i32_0 : i32, i32
  }
  func.func @transform_2(%arg0: i32) -> (i32, i32) {
    %c0_i32 = arith.constant 0 : i32
    %c0_i32_0 = arith.constant 0 : i32
    %c0_i32_1 = arith.constant 0 : i32
    return %c0_i32, %c0_i32_0 : i32, i32
  }
  func.func @transform_3(%arg0: i32) -> (i32, i32) {
    %c0_i32 = arith.constant 0 : i32
    %c0_i32_0 = arith.constant 0 : i32
    %c0_i32_1 = arith.constant 0 : i32
    return %c0_i32, %c0_i32_0 : i32, i32
  }
  func.func @transform_4(%arg0: i32) -> (i32, i32) {
    %c0_i32 = arith.constant 0 : i32
    %c0_i32_0 = arith.constant 0 : i32
    %c0_i32_1 = arith.constant 0 : i32
    return %c0_i32, %c0_i32_0 : i32, i32
  }
  func.func @transform_5(%arg0: i32) -> (i32, i32) {
    %c0_i32 = arith.constant 0 : i32
    %c0_i32_0 = arith.constant 0 : i32
    return %c0_i32, %arg0 : i32, i32
  }
}

</mosaic_0001>

<bundles_post_ra>
// kernel: tpu_custom_call.1
= control target key start
LH: loop header
LB: loop body
LE: loop exit
PB: predicated region body
PF: predicated region fallthrough
CT: control target
= control target key end

     0   :  { %10 = vsyncpa [#allocation3], 0  ;;  %s576_s0 = inlined_call_operand.vmem [shape: f32[36,128], index: 0, kind: input, shape index: {}]   ;;  %s577_s1 = inlined_call_operand.hbm [shape: f32[32,36], index: 1, kind: input, shape index: {}]   ;;  %s578_s2 = inlined_call_operand.vmem [shape: f32[32,1], index: 2, kind: input, shape index: {}]   ;;  %s579_s3 = inlined_call_operand.vmem [shape: f32[32,32], index: 3, kind: input, shape index: {}]   ;;  %s580_s4 = inlined_call_operand.vmem [shape: f32[32,1], index: 4, kind: input, shape index: {}]   ;;  %s581_s5 = inlined_call_operand.hbm [shape: f32[32,128], index: 5, kind: output, shape index: {}]  }
   0x1   :  { %11 = vsyncpa [#allocation4], 0  ;;  %s452_s18 = smov [#allocation2]   ;;  %s404_s22 = scalar_lea.hbm %s577_s1, 512 }
   0x2   :  { %s19_s19 = sshll.u32 %s452_s18, 4  ;;  %p405_p0 = scmp.ne.s32.totalorder %s577_s1, %s404_s22  ;;  %s20_s19 = int_to_ptr.vmem [resolvable:$true] %s19_s19 }
   0x3   :  { %p408_p1 = scmp.lt.u32.totalorder %s404_s22, %s577_s1 }
   0x5   :  { %p410_p2 = pnand %p408_p1, %p405_p0 }
   0x7   :  { %413 = shalt.err (!%p410_p2)
}
   0x8   :  { %s414_s27 = scalar_lea.vmem %s20_s19, 512  ;;  %p419_p4 = scmp.lt.s32.totalorder %s20_s19, %s20_s19 }
   0x9   :  { %p415_p3 = scmp.ne.s32.totalorder %s20_s19, %s414_s27  ;;  %p420_p5 = scmp.lt.s32.totalorder %s414_s27, %s414_s27 }
   0xb   :  { %p421_p6 = por %p420_p5, %p419_p4 }
   0xd   :  { %p422_p7 = pnand %p421_p6, %p415_p3 }
   0xf   :  { %425 = shalt.err (!%p422_p7)
}
  0x10   :  { %s453_s28 = smov 128   ;;  %s454_s29 = smov 8  }
  0x11   :  { %25 = dma.hbm_to_vmem [thread:$0]  %s577_s1, 512, %s20_s19, [#allocation3], %s453_s28, %s453_s28, %s454_s29  }
  0x12   :  { %448 = dma.done.wait [#allocation3], 512  }
  0x13   :  { %449 = vsyncadd [#allocation3], 4294966784  ;;  %v455_v0 = vmov 0   ;;  %vm68_vm0 = vcmask 293888   ;;  %v35_v1 = vld [vmem:[%s576_s0] sm:$0xff]  ;;  %v36_v2 = vld [vmem:[%s576_s0 + $0x8] sm:$0xff] }
  0x14   :  { %402 = vset.pattern.permute.xlu0 %v455_v0  ;;  %403 = vset.pattern.permute.xlu1 %v455_v0  ;;  %v37_v3 = vld [vmem:[%s576_s0 + $0x10] sm:$0xff]  ;;  %v381_v4 = vpack.c.bf16 %v36_v2, %v35_v1  ;;  %v38_v5 = vld [vmem:[%s576_s0 + $0x18] sm:$0xff]  ;;  %v40_v6 = vld [vmem:[#allocation2] sm:$0xff]  ;;  %vm81_vm1 = vcmask 1043456   ;;  %vm206_vm2 = vcmask 261120   ;;  %s456_s13 = smov [#allocation5]  }
  0x15   :  { %v385_v7 = vpack.c.bf16 %v38_v5, %v37_v3  ;;  %361 = vmatprep.mubr.msk.f32.mxu0 %vm68_vm0, %v40_v6  ;;  %v44_v8 = vld [vmem:[%s578_s2] sm:$0xff]  ;;  %v46_v9 = vld [vmem:[%s578_s2 + $0x10] sm:$0xff]  ;;  %v45_v10 = vld [vmem:[%s578_s2 + $0x8] sm:$0xff]  ;;  %s313_s14 = sshll.u32 %s456_s13, 4  ;;  %s314_s14 = int_to_ptr.vmem [resolvable:$true] %s313_s14 }
  0x16   :  { %382 = vmatprep.subr.bf16.mxu0 %v381_v4  ;;  %50 = vperm.xlu0 %402, %v44_v8   ;;  %v39_v11 = vld [vmem:[%s576_s0 + $0x20] sm:$0xf]  ;;  %v47_v12 = vld [vmem:[%s578_s2 + $0x18] sm:$0xff]  ;;  %v41_v14 = vld [vmem:[#allocation2 + $0x8] sm:$0xff]  ;;  %p431_p9 = scmp.lt.s32.totalorder %s314_s14, %s314_s14 }
  0x17   :  { %384 = vmatpush3.bf16.msra.mxu0 %v381_v4  ;;  %60 = vperm.xlu1 %403, %v46_v9   ;;  %v182_v13 = vld [vmem:[%s580_s4] sm:$0xff]  ;;  %v183_v15 = vld [vmem:[%s580_s4 + $0x8] sm:$0xff]  ;;  %v42_v16 = vld [vmem:[#allocation2 + $0x10] sm:$0xff] }
  0x18   :  { %386 = vmatprep.subr.bf16.mxu0 %v385_v7  ;;  %v184_v17 = vld [vmem:[%s580_s4 + $0x10] sm:$0xff]  ;;  %v43_v18 = vld [vmem:[#allocation2 + $0x18] sm:$0xff]  ;;  %v178_v20 = vld [vmem:[%s579_s3] sm:$0xff] }
  0x19   :  { %v185_v19 = vld [vmem:[%s580_s4 + $0x18] sm:$0xff]  ;;  %375 = vmatprep.mubr.msk.f32.mxu1 %vm206_vm2, %v178_v20  ;;  %v179_v43 = vld [vmem:[%s579_s3 + $0x8] sm:$0xff]  ;;  %v180_v44 = vld [vmem:[%s579_s3 + $0x10] sm:$0xff] }
  0x1a   :  { %55 = vperm.xlu0 %402, %v45_v10   ;;  %v181_v45 = vld [vmem:[%s579_s3 + $0x18] sm:$0xff]  ;;  %s426_s3 = scalar_lea.vmem %s314_s14, 512 }
  0x1b   :  { %388 = vmatpush3.bf16.msra.mxu0 %v385_v7  ;;  %65 = vperm.xlu1 %403, %v47_v12   ;;  %p427_p8 = scmp.ne.s32.totalorder %s314_s14, %s426_s3  ;;  %p432_p10 = scmp.lt.s32.totalorder %s426_s3, %s426_s3 }
  0x1c   :  { %359 = vmatprep.subr.msk.mxu0 %vm81_vm1, %v39_v11 }
  0x1d   :  { %p433_p11 = por %p432_p10, %p431_p9 }
  0x1e   :  { %188 = vperm.xlu0 %402, %v182_v13  }
  0x1f   :  { %360 = vmatpush3.msk.msra.mxu0 %vm81_vm1, %v39_v11  ;;  %193 = vperm.xlu1 %403, %v183_v15   ;;  %p434_p12 = pnand %p433_p11, %p427_p8 }
  0x20   :  { %362 = vmatmul.mubr.msk.f32.vlgmr.msra.gmra.mrb[0].mxu0 %vm68_vm0, %v41_v14 }
  0x21   :  { %364 = vmatprep.mubr.msk.f32.mxu0 %vm68_vm0, %v42_v16 }
  0x22   :  { %198 = vperm.xlu0 %402, %v184_v17  }
  0x23   :  { %203 = vperm.xlu1 %403, %v185_v19  }
  0x24   :  { %365 = vmatmul.mubr.msk.f32.gmra.mrb[2].mxu0 %vm68_vm0, %v43_v18 }
  0x95   :  { %v51_v21 = vpop.permute.xlu0 %50 }
  0x96   :  { %v61_v22 = vpop.permute.xlu1 %60 }
  0x99   :  { %v56_v23 = vpop.permute.xlu0 %55 }
  0x9a   :  { %v66_v29 = vpop.permute.xlu1 %65 }
  0x9d   :  { %v189_v47 = vpop.permute.xlu0 %188 }
  0x9e   :  { %v194_v46 = vpop.permute.xlu1 %193 }
  0xa1   :  { %v199_v54 = vpop.permute.xlu0 %198 }
  0xa2   :  { %v204_v52 = vpop.permute.xlu1 %203 }
  0xf3   :  { %v363_v24 = vpop.f32.mrb[0].mxu0 }
  0xf4   :  { %v157_v25 = vadd.f32 %v363_v24, %v56_v23  ;;  %v151_v26 = vpop.f32.mrb[1].mxu0 }
  0xf5   :  { %v152_v27 = vadd.f32 %v151_v26, %v51_v21 }
  0xf6   :  { %v171_v28 = vmul.f32 0.1, %v157_v25 }
  0xf7   :  { %v170_v30 = vmul.f32 0.1, %v152_v27  ;;  %v366_v31 = vpop.f32.mrb[2].mxu0 }
  0xf8   :  { %v175_v32 = vmax.f32 %v157_v25, %v171_v28  ;;  %v167_v33 = vadd.f32 %v366_v31, %v66_v29  ;;  %v161_v34 = vpop.f32.mrb[3].mxu0 }
  0xf9   :  { %v174_v35 = vmax.f32 %v152_v27, %v170_v30  ;;  %v162_v36 = vadd.f32 %v161_v34, %v61_v22 }
  0xfa   :  { %v173_v37 = vmul.f32 0.1, %v167_v33 }
  0xfb   :  { %v172_v38 = vmul.f32 0.1, %v162_v36  ;;  %v389_v39 = vpack.c.bf16 %v175_v32, %v174_v35 }
  0xfc   :  { %v177_v40 = vmax.f32 %v167_v33, %v173_v37 }
  0xfd   :  { %v176_v41 = vmax.f32 %v162_v36, %v172_v38  ;;  %390 = vmatprep.subr.bf16.mxu1 %v389_v39 }
  0xfe   :  { %392 = vmatpush3.bf16.msra.mxu1 %v389_v39 }
  0xff   :  { %v393_v42 = vpack.c.bf16 %v177_v40, %v176_v41 }
 0x101   :  { %394 = vmatprep.subr.bf16.mxu1 %v393_v42 }
 0x102   :  { %396 = vmatpush3.bf16.msra.mxu1 %v393_v42 }
 0x105   :  { %376 = vmatmul.mubr.msk.f32.vlgmr.msra.gmra.mrb[0].mxu1 %vm206_vm2, %v179_v43 }
 0x106   :  { %378 = vmatprep.mubr.msk.f32.mxu1 %vm206_vm2, %v180_v44 }
 0x109   :  { %379 = vmatmul.mubr.msk.f32.gmra.mrb[2].mxu1 %vm206_vm2, %v181_v45 }
 0x1d8   :  { %v377_v48 = vpop.f32.mrb[0].mxu1 }
 0x1d9   :  { %v291_v49 = vadd.f32 %v377_v48, %v194_v46  ;;  %v285_v50 = vpop.f32.mrb[1].mxu1 }
 0x1da   :  { %v286_v51 = vadd.f32 %v285_v50, %v189_v47 }
 0x1db   :  { %305 = vst [vmem:[#allocation5 + $0x8] sm:$0xff] %v291_v49 }
 0x1dc   :  { %304 = vst [vmem:[#allocation5] sm:$0xff] %v286_v51  ;;  %v380_v53 = vpop.f32.mrb[2].mxu1 }
 0x1dd   :  { %v301_v55 = vadd.f32 %v380_v53, %v204_v52  ;;  %v295_v56 = vpop.f32.mrb[3].mxu1 }
 0x1de   :  { %v296_v57 = vadd.f32 %v295_v56, %v199_v54 }
 0x1df   :  { %307 = vst [vmem:[#allocation5 + $0x18] sm:$0xff] %v301_v55 }
 0x1e0   :  { %306 = vst [vmem:[#allocation5 + $0x10] sm:$0xff] %v296_v57 }
 0x1e1   :  { %437 = shalt.err (!%p434_p12)
}
 0x1e2   :  { %s438_s17 = scalar_lea.hbm %s581_s5, 512 }
 0x1e3   :  { %p439_p13 = scmp.ne.s32.totalorder %s581_s5, %s438_s17  ;;  %p442_p0 = scmp.lt.u32.totalorder %s438_s17, %s581_s5 }
 0x1e5   :  { %p444_p1 = pnand %p442_p0, %p439_p13 }
 0x1e7   :  { %447 = shalt.err (!%p444_p1)
}
 0x1e8   :  { %319 = dma.vmem_to_hbm [thread:$0]  %s314_s14, 512, %s581_s5, [#allocation4], %s453_s28, %s453_s28, %s454_s29  }
 0x1e9   :  { %450 = dma.done.wait [#allocation4], 512  }
 0x1ea   :  { %451 = vsyncadd [#allocation4], 4294966784 }
 0x1eb   :  { %323 = vsyncpa [#allocation3], 1 }
 0x1ec   :  { %324 = vsyncpa [#allocation4], 1 }

</bundles_post_ra>
